<compile_context>
chip_gen: v7x
topology: tpu7x:2x2x1
jax: 0.10.0
libtpu: 0.0.40
codegen_flags: <defaults>
</compile_context>

<pallas_src>
import functools

import numpy as np
import jax
import jax.numpy as jnp
from jax.experimental import pallas as pl
from jax.experimental.pallas import tpu as pltpu

LEAKY_SLOPE = 0.01  # nn.LeakyReLU() default negative_slope


def _leaky(v):
    return jnp.where(v >= 0.0, v, LEAKY_SLOPE * v)


# ----------------------------------------------------------------------------
# Fused Pallas kernel: whole forward pass in one call, grid=(1,)
# ----------------------------------------------------------------------------
def _fused_cnn_kernel(p_ref, w1_ref, w2_ref, fcw_ref, b_ref, o_ref,
                      *, batch, n_taps, grp_rows, grp_pad, fp):
    # ---- conv1 (3x3 VALID) as a single (M, 9*Cin) @ (9*Cin, 256) matmul ----
    z1 = jnp.dot(p_ref[...], w1_ref[...], preferred_element_type=jnp.float32)
    z1 = _leaky(z1 + b_ref[0:1, :])                      # (4*grp_pad, 256)

    # ---- MaxPool2d(2): rows are (window-offset g, tap, batch); pool = max over
    # the four g-groups (contiguous, 8-aligned 2-D slices, full-vreg maxes). ----
    pooled = z1[0:grp_rows, :]
    for g in range(1, 4):
        pooled = jnp.maximum(pooled, z1[g * grp_pad:g * grp_pad + grp_rows, :])

    # ---- conv2 (3x3 -> 1x1): concatenate the 9 pooled taps along lanes and do
    # ONE long-K bf16 matmul (batch, 9*256) @ (9*256, 128). ----
    pieces = [pooled[t * batch:(t + 1) * batch, :] for t in range(n_taps)]
    lhs2 = jnp.concatenate(pieces, axis=-1).astype(jnp.bfloat16)
    z2 = jnp.dot(lhs2, w2_ref[...], preferred_element_type=jnp.float32)
    z2 = _leaky(z2 + b_ref[1:2, 0:fp])                   # (batch, 128)

    # ---- flatten (1x1 spatial) -> fc1 -> LeakyReLU -> fc2 (bf16 weights) ----
    h1 = jnp.dot(z2.astype(jnp.bfloat16), fcw_ref[0:fp, :],
                 preferred_element_type=jnp.float32)
    h1 = _leaky(h1 + b_ref[2:3, 0:fp])
    out = jnp.dot(h1.astype(jnp.bfloat16), fcw_ref[fp:2 * fp, :],
                  preferred_element_type=jnp.float32)
    o_ref[...] = (out + b_ref[3:4, 0:fp]).astype(o_ref.dtype)


# ----------------------------------------------------------------------------
# One-time parameter preparation: pad to lane-dense widths, pack, cast to bf16
# ----------------------------------------------------------------------------
def prepare_params(params, num_classes):
    w1, b1 = params["conv1_w"], params["conv1_b"]    # (200, Cin, 3, 3), (200,)
    w2, b2 = params["conv2_w"], params["conv2_b"]    # (100, 200, 3, 3), (100,)
    wf1, bf1 = params["fc1_w"], params["fc1_b"]      # (64, 100), (64,)
    wf2, bf2 = params["fc2_w"], params["fc2_b"]      # (nc, 64), (nc,)

    C1, Cin, KH, KW = w1.shape                       # 200, 4, 3, 3
    C2 = w2.shape[0]                                 # 100
    F1 = wf1.shape[0]                                # 64
    C1P, C2P, FP = 256, 128, 128                     # padded lane widths

    # conv1: (9*Cin, 256) matrix; row order (ci, ki, kj) matches the im2col cols.
    w1m = jnp.pad(w1.reshape(C1, Cin * KH * KW).T, ((0, 0), (0, C1P - C1)))

    # conv2: (9*256, 128) matrix; row order (tap=(i,j), ci) matches the pooled
    # lane-concat in the kernel.  Contiguous reshape, padding rows/cols are 0.
    w2m = jnp.transpose(w2, (2, 3, 1, 0)).reshape(KH * KW, C1, C2)
    w2m = jnp.pad(w2m, ((0, 0), (0, C1P - C1), (0, C2P - C2)))
    w2m = w2m.reshape(KH * KW * C1P, C2P)

    # fc1 + fc2 stacked into one (256, 128) matrix.  Zero padding everywhere is
    # load-bearing: it keeps the padded activation lanes exactly zero.
    wf1m = jnp.zeros((C2P, FP), jnp.float32).at[:C2, :F1].set(wf1.T)
    wf2m = jnp.zeros((FP, FP), jnp.float32).at[:F1, :num_classes].set(wf2.T)
    fcw = jnp.concatenate([wf1m, wf2m], axis=0)

    # All four bias vectors packed into one (8, 256) f32 array (single DMA).
    biases = jnp.zeros((8, C1P), jnp.float32)
    biases = biases.at[0, :C1].set(b1)
    biases = biases.at[1, :C2].set(b2)
    biases = biases.at[2, :F1].set(bf1)
    biases = biases.at[3, :num_classes].set(bf2)

    return dict(w1=w1m.astype(jnp.bfloat16),
                w2=w2m.astype(jnp.bfloat16),
                fcw=fcw.astype(jnp.bfloat16),
                biases=biases)


def init_params(key, num_classes, num_in_channels):
    ks = jax.random.split(key, 8)

    def init(k, shape, scale=0.05):
        return scale * jax.random.normal(k, shape, dtype=jnp.float32)

    return dict(
        conv1_w=init(ks[0], (200, num_in_channels, 3, 3)),
        conv1_b=init(ks[1], (200,)),
        conv2_w=init(ks[2], (100, 200, 3, 3)),
        conv2_b=init(ks[3], (100,)),
        fc1_w=init(ks[4], (64, 100)),
        fc1_b=init(ks[5], (64,)),
        fc2_w=init(ks[6], (num_classes, 64)),
        fc2_b=init(ks[7], (num_classes,)),
    )


# ----------------------------------------------------------------------------
# Forward pass: small im2col/layout glue in the wrapper + one pallas_call
# ----------------------------------------------------------------------------
@functools.partial(jax.jit, static_argnums=(2,))
def simple_cnn_forward(x, p, num_classes):
    B, Cin, H, W = x.shape
    KH = KW = 3
    OH, OW = H - KH + 1, W - KW + 1
    assert OH % 2 == 0 and OW % 2 == 0, "MaxPool2d(2) needs an even conv1 output"
    PH, PW = OH // 2, OW // 2
    assert (PH, PW) == (KH, KW), "fc1(in=100) requires conv2 output 1x1 (8x8 input)"

    n_taps = PH * PW                                # 9 pooled positions / conv2 taps
    grp_rows = n_taps * B                           # rows per 2x2-window offset group
    grp_pad = ((grp_rows + 7) // 8) * 8             # 8-align each group

    # im2col for conv1.  Rows ordered (window offset g=(di,dj), tap=(ph,pw), b)
    # so the kernel's maxpool and conv2 lane-concat use only contiguous slices.
    g_di = np.arange(4) // 2
    g_dj = np.arange(4) % 2
    t_ph = np.arange(n_taps) // PW
    t_pw = np.arange(n_taps) % PW
    kk_i = np.arange(KH * KW) // KW
    kk_j = np.arange(KH * KW) % KW
    rows_h = 2 * t_ph[None, :, None] + g_di[:, None, None] + kk_i[None, None, :]
    cols_w = 2 * t_pw[None, :, None] + g_dj[:, None, None] + kk_j[None, None, :]
    patches = x[:, :, rows_h, cols_w]               # (B, Cin, 4, n_taps, 9)
    patches = jnp.transpose(patches, (2, 3, 0, 1, 4))
    patches = patches.reshape(4, grp_rows, Cin * KH * KW)
    patches = jnp.pad(patches, ((0, 0), (0, grp_pad - grp_rows), (0, 0)))
    patches = patches.reshape(4 * grp_pad, Cin * KH * KW).astype(jnp.bfloat16)

    FP = p["fcw"].shape[1]                          # 128
    kernel = functools.partial(_fused_cnn_kernel, batch=B, n_taps=n_taps,
                               grp_rows=grp_rows, grp_pad=grp_pad, fp=FP)

    out = pl.pallas_call(
        kernel,
        grid=(1,),
        in_specs=[
            pl.BlockSpec(patches.shape, lambda i: (0, 0)),      # im2col patches
            pl.BlockSpec(p["w1"].shape, lambda i: (0, 0)),      # conv1 W (36, 256) bf16
            pl.BlockSpec(p["w2"].shape, lambda i: (0, 0)),      # conv2 W (2304, 128) bf16
            pl.BlockSpec(p["fcw"].shape, lambda i: (0, 0)),     # fc1+fc2 W (256, 128) bf16
            pl.BlockSpec(p["biases"].shape, lambda i: (0, 0)),  # packed biases (8, 256) f32
        ],
        out_specs=pl.BlockSpec((B, FP), lambda i: (0, 0)),
        out_shape=jax.ShapeDtypeStruct((B, FP), jnp.float32),
        compiler_params=pltpu.CompilerParams(dimension_semantics=("arbitrary",)),
    )(patches, p["w1"], p["w2"], p["fcw"], p["biases"])

    return out[:, :num_classes]                     # drop lane padding


# ----------------------------------------------------------------------------
# Pure-JAX f32 reference of the PyTorch forward (for a parity check)
# ----------------------------------------------------------------------------
def reference_forward(x, params):
    dn = ("NCHW", "OIHW", "NCHW")
    z = jax.lax.conv_general_dilated(x, params["conv1_w"], (1, 1), "VALID",
                                     dimension_numbers=dn)
    z = _leaky(z + params["conv1_b"][None, :, None, None])
    Bz, C, Hh, Ww = z.shape
    z = z.reshape(Bz, C, Hh // 2, 2, Ww // 2, 2).max(axis=(3, 5))
    z = jax.lax.conv_general_dilated(z, params["conv2_w"], (1, 1), "VALID",
                                     dimension_numbers=dn)
    z = _leaky(z + params["conv2_b"][None, :, None, None])
    z = z.reshape(z.shape[0], -1)
    z = _leaky(z @ params["fc1_w"].T + params["fc1_b"])
    return z @ params["fc2_w"].T + params["fc2_b"]


if __name__ == "__main__":
    num_classes = 10
    num_in_channels = 4
    B, H, W = 2, 8, 8  # 8x8 input => conv2 output is 1x1 => flatten size 100

    key = jax.random.PRNGKey(0)
    kx, kp = jax.random.split(key)
    x = jax.random.normal(kx, (B, num_in_channels, H, W), dtype=jnp.float32)
    params = init_params(kp, num_classes, num_in_channels)
    prepped = prepare_params(params, num_classes)

    out = simple_cnn_forward(x, prepped, num_classes)
    out = jax.block_until_ready(out)
    assert out.shape == (B, num_classes), out.shape
    assert bool(jnp.all(jnp.isfinite(out)))

    # bf16 weights/activations in the kernel => ~1e-2 relative deviation budget.
    ref = reference_forward(x, params)
    max_err = float(jnp.max(jnp.abs(out - ref)))
    assert jnp.allclose(out, ref, atol=7.5e-2, rtol=7.5e-2), max_err
    print("KERNEL_OK")
</pallas_src>

<mosaic_0001>
module attributes {stable_mosaic.version = 11 : i64} {
  func.func @_fused_cnn_kernel(%arg0: i32, %arg1: memref<96x36xbf16, #tpu.memory_space<vmem>>, %arg2: memref<36x256xbf16, #tpu.memory_space<vmem>>, %arg3: memref<2304x128xbf16, #tpu.memory_space<vmem>>, %arg4: memref<256x128xbf16, #tpu.memory_space<vmem>>, %arg5: memref<8x256xf32, #tpu.memory_space<vmem>>, %arg6: memref<2x128xf32, #tpu.memory_space<vmem>>) attributes {dimension_semantics = [#tpu.dimension_semantics<arbitrary>], iteration_bounds = array<i64: 1>, scalar_prefetch = 0 : i64, scratch_operands = 0 : i64, tpu.core_type = #tpu.core_type<tc>, window_params = [{pipeline_mode = #tpu.pipeline_mode<synchronous>, transform_indices = @transform_0, window_bounds = array<i64: 96, 36>}, {pipeline_mode = #tpu.pipeline_mode<synchronous>, transform_indices = @transform_1, window_bounds = array<i64: 36, 256>}, {pipeline_mode = #tpu.pipeline_mode<synchronous>, transform_indices = @transform_2, window_bounds = array<i64: 2304, 128>}, {pipeline_mode = #tpu.pipeline_mode<synchronous>, transform_indices = @transform_3, window_bounds = array<i64: 256, 128>}, {pipeline_mode = #tpu.pipeline_mode<synchronous>, transform_indices = @transform_4, window_bounds = array<i64: 8, 256>}, {pipeline_mode = #tpu.pipeline_mode<synchronous>, transform_indices = @transform_5, window_bounds = array<i64: 2, 128>}]} {
    %c0 = arith.constant 0 : index
    %c0_0 = arith.constant 0 : index
    %0 = vector.load %arg1[%c0, %c0_0] : memref<96x36xbf16, #tpu.memory_space<vmem>>, vector<96x36xbf16>
    %c0_1 = arith.constant 0 : index
    %c0_2 = arith.constant 0 : index
    %1 = vector.load %arg2[%c0_1, %c0_2] : memref<36x256xbf16, #tpu.memory_space<vmem>>, vector<36x256xbf16>
    %cst = arith.constant dense<0.000000e+00> : vector<96x256xf32>
    %2 = tpu.matmul %0, %1, %cst {dimension_numbers = #tpu.dot_dimension_numbers<[1], [0], [0], [1], [0, 0, 1, 1], [], []>} : vector<96x36xbf16>, vector<36x256xbf16>, vector<96x256xf32> -> vector<96x256xf32>
    %c0_3 = arith.constant 0 : index
    %c0_4 = arith.constant 0 : index
    %3 = vector.load %arg5[%c0_3, %c0_4] : memref<8x256xf32, #tpu.memory_space<vmem>>, vector<1x256xf32>
    %4 = vector.broadcast %3 : vector<1x256xf32> to vector<96x256xf32>
    %5 = arith.addf %2, %4 : vector<96x256xf32>
    %cst_5 = arith.constant 0.000000e+00 : f32
    %6 = vector.broadcast %cst_5 : f32 to vector<96x256xf32>
    %7 = arith.cmpf oge, %5, %6 : vector<96x256xf32>
    %cst_6 = arith.constant 0.00999999977 : f32
    %8 = vector.broadcast %cst_6 : f32 to vector<96x256xf32>
    %9 = arith.mulf %8, %5 : vector<96x256xf32>
    %10 = arith.select %7, %5, %9 : vector<96x256xi1>, vector<96x256xf32>
    %11 = vector.extract_strided_slice %10 {offsets = [0, 0], sizes = [18, 256], strides = [1, 1]} : vector<96x256xf32> to vector<18x256xf32>
    %12 = vector.extract_strided_slice %10 {offsets = [24, 0], sizes = [18, 256], strides = [1, 1]} : vector<96x256xf32> to vector<18x256xf32>
    %13 = arith.maximumf %11, %12 : vector<18x256xf32>
    %14 = vector.extract_strided_slice %10 {offsets = [48, 0], sizes = [18, 256], strides = [1, 1]} : vector<96x256xf32> to vector<18x256xf32>
    %15 = arith.maximumf %13, %14 : vector<18x256xf32>
    %16 = vector.extract_strided_slice %10 {offsets = [72, 0], sizes = [18, 256], strides = [1, 1]} : vector<96x256xf32> to vector<18x256xf32>
    %17 = arith.maximumf %15, %16 : vector<18x256xf32>
    %18 = vector.extract_strided_slice %17 {offsets = [0, 0], sizes = [2, 256], strides = [1, 1]} : vector<18x256xf32> to vector<2x256xf32>
    %19 = vector.extract_strided_slice %17 {offsets = [2, 0], sizes = [2, 256], strides = [1, 1]} : vector<18x256xf32> to vector<2x256xf32>
    %20 = vector.extract_strided_slice %17 {offsets = [4, 0], sizes = [2, 256], strides = [1, 1]} : vector<18x256xf32> to vector<2x256xf32>
    %21 = vector.extract_strided_slice %17 {offsets = [6, 0], sizes = [2, 256], strides = [1, 1]} : vector<18x256xf32> to vector<2x256xf32>
    %22 = vector.extract_strided_slice %17 {offsets = [8, 0], sizes = [2, 256], strides = [1, 1]} : vector<18x256xf32> to vector<2x256xf32>
    %23 = vector.extract_strided_slice %17 {offsets = [10, 0], sizes = [2, 256], strides = [1, 1]} : vector<18x256xf32> to vector<2x256xf32>
    %24 = vector.extract_strided_slice %17 {offsets = [12, 0], sizes = [2, 256], strides = [1, 1]} : vector<18x256xf32> to vector<2x256xf32>
    %25 = vector.extract_strided_slice %17 {offsets = [14, 0], sizes = [2, 256], strides = [1, 1]} : vector<18x256xf32> to vector<2x256xf32>
    %26 = vector.extract_strided_slice %17 {offsets = [16, 0], sizes = [2, 256], strides = [1, 1]} : vector<18x256xf32> to vector<2x256xf32>
    %27 = tpu.concatenate %18, %19, %20, %21, %22, %23, %24, %25, %26 in 1 : vector<2x256xf32>, vector<2x256xf32>, vector<2x256xf32>, vector<2x256xf32>, vector<2x256xf32>, vector<2x256xf32>, vector<2x256xf32>, vector<2x256xf32>, vector<2x256xf32> -> vector<2x2304xf32>
    %28 = arith.truncf %27 : vector<2x2304xf32> to vector<2x2304xbf16>
    %c0_7 = arith.constant 0 : index
    %c0_8 = arith.constant 0 : index
    %29 = vector.load %arg3[%c0_7, %c0_8] : memref<2304x128xbf16, #tpu.memory_space<vmem>>, vector<2304x128xbf16>
    %cst_9 = arith.constant dense<0.000000e+00> : vector<2x128xf32>
    %30 = tpu.matmul %28, %29, %cst_9 {dimension_numbers = #tpu.dot_dimension_numbers<[1], [0], [0], [1], [0, 0, 1, 1], [], []>} : vector<2x2304xbf16>, vector<2304x128xbf16>, vector<2x128xf32> -> vector<2x128xf32>
    %c1 = arith.constant 1 : index
    %c0_10 = arith.constant 0 : index
    %31 = vector.load %arg5[%c1, %c0_10] : memref<8x256xf32, #tpu.memory_space<vmem>>, vector<1x128xf32>
    %32 = vector.broadcast %31 : vector<1x128xf32> to vector<2x128xf32>
    %33 = arith.addf %30, %32 : vector<2x128xf32>
    %cst_11 = arith.constant 0.000000e+00 : f32
    %34 = vector.broadcast %cst_11 : f32 to vector<2x128xf32>
    %35 = arith.cmpf oge, %33, %34 : vector<2x128xf32>
    %cst_12 = arith.constant 0.00999999977 : f32
    %36 = vector.broadcast %cst_12 : f32 to vector<2x128xf32>
    %37 = arith.mulf %36, %33 : vector<2x128xf32>
    %38 = arith.select %35, %33, %37 : vector<2x128xi1>, vector<2x128xf32>
    %39 = arith.truncf %38 : vector<2x128xf32> to vector<2x128xbf16>
    %c0_13 = arith.constant 0 : index
    %c0_14 = arith.constant 0 : index
    %40 = vector.load %arg4[%c0_13, %c0_14] : memref<256x128xbf16, #tpu.memory_space<vmem>>, vector<128x128xbf16>
    %cst_15 = arith.constant dense<0.000000e+00> : vector<2x128xf32>
    %41 = tpu.matmul %39, %40, %cst_15 {dimension_numbers = #tpu.dot_dimension_numbers<[1], [0], [0], [1], [0, 0, 1, 1], [], []>} : vector<2x128xbf16>, vector<128x128xbf16>, vector<2x128xf32> -> vector<2x128xf32>
    %c2 = arith.constant 2 : index
    %c0_16 = arith.constant 0 : index
    %42 = vector.load %arg5[%c2, %c0_16] : memref<8x256xf32, #tpu.memory_space<vmem>>, vector<1x128xf32>
    %43 = vector.broadcast %42 : vector<1x128xf32> to vector<2x128xf32>
    %44 = arith.addf %41, %43 : vector<2x128xf32>
    %cst_17 = arith.constant 0.000000e+00 : f32
    %45 = vector.broadcast %cst_17 : f32 to vector<2x128xf32>
    %46 = arith.cmpf oge, %44, %45 : vector<2x128xf32>
    %cst_18 = arith.constant 0.00999999977 : f32
    %47 = vector.broadcast %cst_18 : f32 to vector<2x128xf32>
    %48 = arith.mulf %47, %44 : vector<2x128xf32>
    %49 = arith.select %46, %44, %48 : vector<2x128xi1>, vector<2x128xf32>
    %50 = arith.truncf %49 : vector<2x128xf32> to vector<2x128xbf16>
    %c128 = arith.constant 128 : index
    %c0_19 = arith.constant 0 : index
    %51 = vector.load %arg4[%c128, %c0_19] : memref<256x128xbf16, #tpu.memory_space<vmem>>, vector<128x128xbf16>
    %cst_20 = arith.constant dense<0.000000e+00> : vector<2x128xf32>
    %52 = tpu.matmul %50, %51, %cst_20 {dimension_numbers = #tpu.dot_dimension_numbers<[1], [0], [0], [1], [0, 0, 1, 1], [], []>} : vector<2x128xbf16>, vector<128x128xbf16>, vector<2x128xf32> -> vector<2x128xf32>
    %c3 = arith.constant 3 : index
    %c0_21 = arith.constant 0 : index
    %53 = vector.load %arg5[%c3, %c0_21] : memref<8x256xf32, #tpu.memory_space<vmem>>, vector<1x128xf32>
    %54 = vector.broadcast %53 : vector<1x128xf32> to vector<2x128xf32>
    %55 = arith.addf %52, %54 : vector<2x128xf32>
    %c0_22 = arith.constant 0 : index
    %c0_23 = arith.constant 0 : index
    %56 = vector.load %arg6[%c0_22, %c0_23] : memref<2x128xf32, #tpu.memory_space<vmem>>, vector<2x128xf32>
    tpu.vector_store %arg6[%c0_22, %c0_23], %55 {strides = array<i32>} : memref<2x128xf32, #tpu.memory_space<vmem>>, vector<2x128xf32>,
    return
  }
  func.func @transform_0(%arg0: i32) -> (i32, i32) {
    %c0_i32 = arith.constant 0 : i32
    %c0_i32_0 = arith.constant 0 : i32
    %c0_i32_1 = arith.constant 0 : i32
    return %c0_i32, %c0_i32_0 : i32, i32
  }
  func.func @transform_1(%arg0: i32) -> (i32, i32) {
    %c0_i32 = arith.constant 0 : i32
    %c0_i32_0 = arith.constant 0 : i32
    %c0_i32_1 = arith.constant 0 : i32
    return %c0_i32, %c0_i32_0 : i32, i32
  }
  func.func @transform_2(%arg0: i32) -> (i32, i32) {
    %c0_i32 = arith.constant 0 : i32
    %c0_i32_0 = arith.constant 0 : i32
    %c0_i32_1 = arith.constant 0 : i32
    return %c0_i32, %c0_i32_0 : i32, i32
  }
  func.func @transform_3(%arg0: i32) -> (i32, i32) {
    %c0_i32 = arith.constant 0 : i32
    %c0_i32_0 = arith.constant 0 : i32
    %c0_i32_1 = arith.constant 0 : i32
    return %c0_i32, %c0_i32_0 : i32, i32
  }
  func.func @transform_4(%arg0: i32) -> (i32, i32) {
    %c0_i32 = arith.constant 0 : i32
    %c0_i32_0 = arith.constant 0 : i32
    %c0_i32_1 = arith.constant 0 : i32
    return %c0_i32, %c0_i32_0 : i32, i32
  }
  func.func @transform_5(%arg0: i32) -> (i32, i32) {
    %c0_i32 = arith.constant 0 : i32
    %c0_i32_0 = arith.constant 0 : i32
    %c0_i32_1 = arith.constant 0 : i32
    return %c0_i32, %c0_i32_0 : i32, i32
  }
}

</mosaic_0001>

<bundles_post_ra>
// kernel: simple_cnn_forward.1
= control target key start
LH: loop header
LB: loop body
LE: loop exit
PB: predicated region body
PF: predicated region fallthrough
CT: control target
= control target key end

     0   :  { %v2744_v2 = vmov 0   ;;  %vm125_vm0 = vcmask 1041408   ;;  %vm106_vm1 = vcmask 293888   ;;  %s3397_s0 = inlined_call_operand.vmem [shape: bf16[96,36], index: 0, kind: input, shape index: {}]   ;;  %s3398_s1 = inlined_call_operand.vmem [shape: bf16[36,256], index: 1, kind: input, shape index: {}]   ;;  %s3399_s2 = inlined_call_operand.vmem [shape: bf16[2304,128], index: 2, kind: input, shape index: {}]   ;;  %s3400_s3 = inlined_call_operand.vmem [shape: bf16[256,128], index: 3, kind: input, shape index: {}]   ;;  %s3401_s4 = inlined_call_operand.vmem [shape: f32[8,256], index: 4, kind: input, shape index: {}]   ;;  %s3402_s5 = inlined_call_operand.hbm [shape: f32[2,128], index: 5, kind: output, shape index: {}]  }
   0x1   :  { %v2546_v0 = vld [vmem:[%s3398_s1 + $0x4] ss:$8 sps:$4 sm:$0xff]   ;;  %v2548_v1 = vld [vmem:[%s3398_s1] ss:$8 sps:$4 sm:$0xff]   ;;  %164 = vmatprep.mubr.bf16.mxu0 %v2744_v2  ;;  %v2549_v3 = vld [vmem:[%s3398_s1 + $0x14] ss:$8 sps:$4 sm:$0xff]  }
   0x2   :  { %132 = vmatprep.subr.bf16.mxu0 %v2546_v0  ;;  %v38_v4 = vld [vmem:[%s3398_s1 + $0x20] sm:$0x33]  ;;  %v2551_v5 = vld [vmem:[%s3398_s1 + $0x10] ss:$8 sps:$4 sm:$0xff]   ;;  %v2555_v10 = vld [vmem:[%s3397_s0 + $0x8] sm:$0xff]  }
   0x3   :  { %133 = vmatpush1.bf16.msra.mxu0 %v2548_v1  ;;  %v2118_v6 = vcombine.high %v38_v4, %v38_v4  ;;  %v2117_v7 = vcombine.low %v38_v4, %v38_v4  ;;  %v2554_v9 = vld [vmem:[%s3397_s0] sm:$0xff]   ;;  %v2556_v11 = vld [vmem:[%s3397_s0 + $0x10] sm:$0xff]   ;;  %v2557_v12 = vld [vmem:[%s3397_s0 + $0x18] sm:$0xff]  }
   0x4   :  { %134 = vmatprep.subr.bf16.mxu0 %v2549_v3  ;;  %v2558_v13 = vld [vmem:[%s3397_s0 + $0x20] sm:$0xff]   ;;  %v2559_v14 = vld [vmem:[%s3397_s0 + $0x28] sm:$0xff]   ;;  %v2568_v23 = vld [vmem:[%s3399_s2 + $0x50] sm:$0xff]  }
   0x5   :  { %v127_v8 = vsel %vm125_vm0, %v2117_v7, 0  ;;  %v2560_v15 = vld [vmem:[%s3399_s2 + $0x40] sm:$0xff]   ;;  %v2564_v19 = vld [vmem:[%s3399_s2 + $0x48] sm:$0xff]   ;;  %v2569_v24 = vld [vmem:[%s3399_s2 + $0x10] sm:$0xff]  }
   0x6   :  { %v2561_v16 = vld [vmem:[%s3399_s2] sm:$0xff]   ;;  %2286 = vmatprep.subr.bf16.mxu1 %v2560_v15  ;;  %v2565_v20 = vld [vmem:[%s3399_s2 + $0x8] sm:$0xff]   ;;  %v2570_v25 = vld [vmem:[%s3399_s2 + $0xd0] sm:$0xff]  }
   0x7   :  { %135 = vmatpush1.bf16.msra.mxu0 %v2551_v5  ;;  %v2562_v17 = vld [vmem:[%s3399_s2 + $0xc0] sm:$0xff]   ;;  %2287 = vmatpush3.bf16.msra.mxu1 %v2561_v16  ;;  %v2566_v21 = vld [vmem:[%s3399_s2 + $0xc8] sm:$0xff]   ;;  %v2571_v26 = vld [vmem:[%s3399_s2 + $0x90] sm:$0xff]  }
   0x8   :  { %2119 = vmatprep.subr.msk.bf16.mxu0 %vm125_vm0, %v2118_v6  ;;  %v2563_v18 = vld [vmem:[%s3399_s2 + $0x80] sm:$0xff]   ;;  %2288 = vmatprep.subr.bf16.mxu1 %v2564_v19  ;;  %v2567_v22 = vld [vmem:[%s3399_s2 + $0x88] sm:$0xff]   ;;  %v2572_v27 = vld [vmem:[%s3399_s2 + $0x58] sm:$0xff]  }
   0x9   :  { %v2573_v28 = vld [vmem:[%s3399_s2 + $0x18] sm:$0xff]  }
   0xb   :  { %137 = vmatpush1.bf16.msra.mxu0 %v127_v8  ;;  %2289 = vmatpush3.bf16.msra.mxu1 %v2565_v20 }
   0xc   :  { %2308 = vmatprep.subr.bf16.mxu0 %v2562_v17  ;;  %2290 = vmatprep.subr.bf16.mxu1 %v2568_v23 }
   0xe   :  { %2120 = vmatmul.mubr.msk.bf16.vlgmr.msra.gmra.mrb[0].mxu0 %vm106_vm1, %v2554_v9 }
   0xf   :  { %174 = vmatprep.mubr.bf16.mxu0 %v2744_v2  ;;  %2309 = vmatpush3.bf16.msra.mxu0 %v2563_v18 }
  0x10   :  { %2310 = vmatprep.subr.bf16.mxu0 %v2566_v21  ;;  %2291 = vmatpush3.bf16.msra.mxu1 %v2569_v24 }
  0x13   :  { %2311 = vmatpush3.bf16.msra.mxu0 %v2567_v22 }
  0x14   :  { %2312 = vmatprep.subr.bf16.mxu0 %v2570_v25 }
  0x16   :  { %2121 = vmatmul.mubr.msk.bf16.gmra.mrb[4].mxu0 %vm106_vm1, %v2555_v10 }
  0x17   :  { %184 = vmatprep.mubr.bf16.mxu0 %v2744_v2  ;;  %2313 = vmatpush3.bf16.msra.mxu0 %v2571_v26 }
  0x1e   :  { %2122 = vmatmul.mubr.msk.bf16.gmra.mrb[8].mxu0 %vm106_vm1, %v2556_v11 }
  0x1f   :  { %194 = vmatprep.mubr.bf16.mxu0 %v2744_v2 }
  0x26   :  { %2123 = vmatmul.mubr.msk.bf16.gmra.mrb[12].mxu0 %vm106_vm1, %v2557_v12 }
  0x27   :  { %204 = vmatprep.mubr.bf16.mxu0 %v2744_v2 }
  0x2e   :  { %2124 = vmatmul.mubr.msk.bf16.gmra.mrb[16].mxu0 %vm106_vm1, %v2558_v13 }
  0x2f   :  { %214 = vmatprep.mubr.bf16.mxu0 %v2744_v2 }
  0x36   :  { %2125 = vmatmul.mubr.msk.bf16.gmra.mrb[20].mxu0 %vm106_vm1, %v2559_v14 }
  0x37   :  { %10 = vsyncpa [#allocation3], 0  ;;  %2292 = vmatprep.subr.bf16.mxu1 %v2572_v27  ;;  %v2574_v29 = vld [vmem:[%s3399_s2 + $0xd8] sm:$0xff]   ;;  %v2576_v31 = vld [vmem:[%s3399_s2 + $0x60] sm:$0xff]   ;;  %v41_v49 = vlaneseq }
  0x38   :  { %2293 = vmatpush3.bf16.msra.mxu1 %v2573_v28  ;;  %v2575_v30 = vld [vmem:[%s3399_s2 + $0x98] sm:$0xff]   ;;  %2314 = vmatprep.subr.bf16.mxu0 %v2574_v29  ;;  %v2577_v32 = vld [vmem:[%s3399_s2 + $0x20] sm:$0xff]   ;;  %v2580_v35 = vld [vmem:[%s3399_s2 + $0x68] sm:$0xff]  }
  0x39   :  { %2315 = vmatpush3.bf16.msra.mxu0 %v2575_v30  ;;  %2294 = vmatprep.subr.bf16.mxu1 %v2576_v31  ;;  %v2578_v33 = vld [vmem:[%s3399_s2 + $0xe0] sm:$0xff]   ;;  %v2581_v36 = vld [vmem:[%s3399_s2 + $0x28] sm:$0xff]   ;;  %v2584_v39 = vld [vmem:[%s3399_s2 + $0x70] sm:$0xff]   ;;  %v42_v50 = vshrl.u32 %v41_v49, 7 }
  0x3a   :  { %v2579_v34 = vld [vmem:[%s3399_s2 + $0xa0] sm:$0xff]   ;;  %2316 = vmatprep.subr.bf16.mxu0 %v2578_v33  ;;  %v2582_v37 = vld [vmem:[%s3399_s2 + $0xe8] sm:$0xff]   ;;  %v2585_v40 = vld [vmem:[%s3399_s2 + $0x30] sm:$0xff]  }
  0x3b   :  { %v2583_v38 = vld [vmem:[%s3399_s2 + $0xa8] sm:$0xff]   ;;  %v2586_v41 = vld [vmem:[%s3399_s2 + $0xf0] sm:$0xff]   ;;  %v2588_v43 = vld [vmem:[%s3399_s2 + $0x78] sm:$0xff]   ;;  %v43_v51 = vsub.s32 0, %v42_v50  ;;  %v47_v54 = vsub.s32 1, %v42_v50 }
  0x3c   :  { %2295 = vmatpush3.bf16.msra.mxu1 %v2577_v32  ;;  %v2587_v42 = vld [vmem:[%s3399_s2 + $0xb0] sm:$0xff]   ;;  %v2589_v44 = vld [vmem:[%s3399_s2 + $0x38] sm:$0xff]   ;;  %v2592_v47 = vld [vmem:[%s3399_s2 + $0x140] sm:$0xff]  }
  0x3d   :  { %2317 = vmatpush3.bf16.msra.mxu0 %v2579_v34  ;;  %2296 = vmatprep.subr.bf16.mxu1 %v2580_v35  ;;  %v2590_v45 = vld [vmem:[%s3399_s2 + $0xf8] sm:$0xff]   ;;  %v2594_v48 = vld [vmem:[%s3399_s2 + $0x1c0] sm:$0xff]  }
  0x3e   :  { %2318 = vmatprep.subr.bf16.mxu0 %v2582_v37  ;;  %v2591_v46 = vld [vmem:[%s3399_s2 + $0xb8] sm:$0xff]   ;;  %v39_v52 = vld [vmem:[%s3401_s4] ss:$8 sm:$0x3] }
  0x3f   :  { %v2922_v55 = vrot.slane %v39_v52, %v43_v51  ;;  %v2925_v60 = vrot.slane %v39_v52, %v47_v54 }
  0x40   :  { %2297 = vmatpush3.bf16.msra.mxu1 %v2581_v36 }
  0x41   :  { %2319 = vmatpush3.bf16.msra.mxu0 %v2583_v38  ;;  %2298 = vmatprep.subr.bf16.mxu1 %v2584_v39 }
  0x42   :  { %2320 = vmatprep.subr.bf16.mxu0 %v2586_v41 }
  0x44   :  { %2299 = vmatpush3.bf16.msra.mxu1 %v2585_v40 }
  0x45   :  { %2321 = vmatpush3.bf16.msra.mxu0 %v2587_v42  ;;  %2300 = vmatprep.subr.bf16.mxu1 %v2588_v43 }
  0x46   :  { %2322 = vmatprep.subr.bf16.mxu0 %v2590_v45 }
  0x48   :  { %2301 = vmatpush3.bf16.msra.mxu1 %v2589_v44 }
  0x49   :  { %2323 = vmatpush3.bf16.msra.mxu0 %v2591_v46  ;;  %2330 = vmatprep.subr.bf16.mxu1 %v2592_v47 }
  0x4a   :  { %2352 = vmatprep.subr.bf16.mxu0 %v2594_v48 }
  0xe1   :  { %v166_v53 = vpop.f32.mrb[0].mxu0 }
  0xe2   :  { %v168_v56 = vpop.f32.mrb[1].mxu0  ;;  %v167_v61 = vadd.f32 %v166_v53, %v2922_v55 }
  0xe3   :  { %v170_v57 = vpop.f32.mrb[2].mxu0  ;;  %v169_v62 = vadd.f32 %v168_v56, %v2925_v60 }
  0xe4   :  { %v171_v58 = vadd.f32 %v170_v57, %v2922_v55  ;;  %v172_v59 = vpop.f32.mrb[3].mxu0  ;;  %v249_v5 = vmul.f32 0.01, %v167_v61  ;;  %vm225_vm2 = vcmp.ge.f32.partialorder %v167_v61, 0.0 }
  0xe5   :  { %v173_v2 = vadd.f32 %v172_v59, %v2925_v60  ;;  %v250_v8 = vmul.f32 0.01, %v169_v62  ;;  %vm226_vm3 = vcmp.ge.f32.partialorder %v169_v62, 0.0 }
  0xe6   :  { %v251_v10 = vmul.f32 0.01, %v171_v58  ;;  %v273_v14 = vsel %vm225_vm2, %v167_v61, %v249_v5  ;;  %vm227_vm6 = vcmp.ge.f32.partialorder %v171_v58, 0.0 }
  0xe7   :  { %v252_v12 = vmul.f32 0.01, %v173_v2  ;;  %vm228_vm7 = vcmp.ge.f32.partialorder %v173_v2, 0.0  ;;  %v274_v16 = vsel %vm226_vm3, %v169_v62, %v250_v8 }
  0xe8   :  { %v275_v23 = vsel %vm227_vm6, %v171_v58, %v251_v10 }
  0xe9   :  { %v176_v63 = vpop.f32.mrb[4].mxu0  ;;  %v276_v24 = vsel %vm228_vm7, %v173_v2, %v252_v12 }
  0xea   :  { %v177_v0 = vadd.f32 %v176_v63, %v2922_v55  ;;  %v178_v1 = vpop.f32.mrb[5].mxu0 }
  0xeb   :  { %v179_v3 = vadd.f32 %v178_v1, %v2925_v60  ;;  %v180_v4 = vpop.f32.mrb[6].mxu0 }
  0xec   :  { %v181_v6 = vadd.f32 %v180_v4, %v2922_v55  ;;  %v182_v7 = vpop.f32.mrb[7].mxu0  ;;  %vm229_vm8 = vcmp.ge.f32.partialorder %v177_v0, 0.0  ;;  %v253_v27 = vmul.f32 0.01, %v177_v0 }
  0xed   :  { %v183_v9 = vadd.f32 %v182_v7, %v2925_v60  ;;  %v254_v31 = vmul.f32 0.01, %v179_v3  ;;  %vm230_vm11 = vcmp.ge.f32.partialorder %v179_v3, 0.0 }
  0xee   :  { %vm231_vm4 = vcmp.ge.f32.partialorder %v181_v6, 0.0  ;;  %v255_v11 = vmul.f32 0.01, %v181_v6  ;;  %v277_v39 = vsel %vm229_vm8, %v177_v0, %v253_v27 }
  0xef   :  { %vm232_vm5 = vcmp.ge.f32.partialorder %v183_v9, 0.0  ;;  %v256_v13 = vmul.f32 0.01, %v183_v9  ;;  %v278_v42 = vsel %vm230_vm11, %v179_v3, %v254_v31 }
  0xf0   :  { %v279_v15 = vsel %vm231_vm4, %v181_v6, %v255_v11 }
  0xf1   :  { %v297_v17 = vmax.f32 %v273_v14, %v279_v15  ;;  %v280_v18 = vsel %vm232_vm5, %v183_v9, %v256_v13  ;;  %v186_v19 = vpop.f32.mrb[8].mxu0 }
  0xf2   :  { %v298_v20 = vmax.f32 %v274_v16, %v280_v18  ;;  %v187_v21 = vadd.f32 %v186_v19, %v2922_v55  ;;  %v188_v22 = vpop.f32.mrb[9].mxu0 }
  0xf3   :  { %v189_v25 = vadd.f32 %v188_v22, %v2925_v60  ;;  %v190_v26 = vpop.f32.mrb[10].mxu0 }
  0xf4   :  { %vm233_vm9 = vcmp.ge.f32.partialorder %v187_v21, 0.0  ;;  %v257_v28 = vmul.f32 0.01, %v187_v21  ;;  %v191_v29 = vadd.f32 %v190_v26, %v2922_v55  ;;  %v192_v30 = vpop.f32.mrb[11].mxu0 }
  0xf5   :  { %vm234_vm10 = vcmp.ge.f32.partialorder %v189_v25, 0.0  ;;  %v258_v32 = vmul.f32 0.01, %v189_v25  ;;  %v193_v33 = vadd.f32 %v192_v30, %v2925_v60 }
  0xf6   :  { %v281_v34 = vsel %vm233_vm9, %v187_v21, %v257_v28  ;;  %vm235_vm12 = vcmp.ge.f32.partialorder %v191_v29, 0.0  ;;  %v259_v35 = vmul.f32 0.01, %v191_v29 }
  0xf7   :  { %v299_v36 = vmax.f32 %v275_v23, %v281_v34  ;;  %v282_v37 = vsel %vm234_vm10, %v189_v25, %v258_v32  ;;  %vm236_vm13 = vcmp.ge.f32.partialorder %v193_v33, 0.0  ;;  %v260_v38 = vmul.f32 0.01, %v193_v33 }
  0xf8   :  { %v300_v40 = vmax.f32 %v276_v24, %v282_v37  ;;  %v283_v41 = vsel %vm235_vm12, %v191_v29, %v259_v35  ;;  %v2593_v35 = vld [vmem:[%s3399_s2 + $0x100] sm:$0xff]   ;;  %vm2746_vm10 = vmmov 0  }
  0xf9   :  { %v301_v43 = vmax.f32 %v277_v39, %v283_v41  ;;  %v284_v44 = vsel %vm236_vm13, %v193_v33, %v260_v38  ;;  %v196_v45 = vpop.f32.mrb[12].mxu0  ;;  %v2596_v39 = vld [vmem:[%s3399_s2 + $0x148] sm:$0xff]  }
  0xfa   :  { %v302_v46 = vmax.f32 %v278_v42, %v284_v44  ;;  %v197_v47 = vadd.f32 %v196_v45, %v2922_v55  ;;  %v198_v48 = vpop.f32.mrb[13].mxu0 }
  0xfb   :  { %v199_v49 = vadd.f32 %v198_v48, %v2925_v60  ;;  %v200_v50 = vpop.f32.mrb[14].mxu0  ;;  %v2595_v48 = vld [vmem:[%s3399_s2 + $0x180] sm:$0xff]  }
  0xfc   :  { %vm237_vm14 = vcmp.ge.f32.partialorder %v197_v47, 0.0  ;;  %v261_v51 = vmul.f32 0.01, %v197_v47  ;;  %v201_v52 = vadd.f32 %v200_v50, %v2922_v55  ;;  %v202_v53 = vpop.f32.mrb[15].mxu0 }
  0xfd   :  { %vm238_vm15 = vcmp.ge.f32.partialorder %v199_v49, 0.0  ;;  %v262_v54 = vmul.f32 0.01, %v199_v49  ;;  %v203_v56 = vadd.f32 %v202_v53, %v2925_v60  ;;  %v2598_v53 = vld [vmem:[%s3399_s2 + $0x1c8] sm:$0xff]  }
  0xfe   :  { %v285_v57 = vsel %vm237_vm14, %v197_v47, %v261_v51  ;;  %vm239_vm0 = vcmp.ge.f32.partialorder %v201_v52, 0.0  ;;  %v263_v58 = vmul.f32 0.01, %v201_v52 }
  0xff   :  { %v303_v59 = vmax.f32 %v297_v17, %v285_v57  ;;  %v286_v61 = vsel %vm238_vm15, %v199_v49, %v262_v54  ;;  %vm240_vm1 = vcmp.ge.f32.partialorder %v203_v56, 0.0  ;;  %v264_v62 = vmul.f32 0.01, %v203_v56  ;;  %v2597_v49 = vld [vmem:[%s3399_s2 + $0x108] sm:$0xff]  }
 0x100   :  { %v304_v63 = vmax.f32 %v298_v20, %v286_v61  ;;  %v287_v0 = vsel %vm239_vm0, %v201_v52, %v263_v58  ;;  %v2599_v58 = vld [vmem:[%s3399_s2 + $0x188] sm:$0xff]   ;;  %v2602_v61 = vld [vmem:[%s3399_s2 + $0x1d0] sm:$0xff]  }
 0x101   :  { %v305_v1 = vmax.f32 %v299_v36, %v287_v0  ;;  %v288_v2 = vsel %vm240_vm1, %v203_v56, %v264_v62  ;;  %v206_v3 = vpop.f32.mrb[16].mxu0  ;;  %v2600_v56 = vld [vmem:[%s3399_s2 + $0x150] sm:$0xff]   ;;  %v2604_v62 = vld [vmem:[%s3399_s2 + $0x158] sm:$0xff]  }
 0x102   :  { %v306_v4 = vmax.f32 %v300_v40, %v288_v2  ;;  %v207_v5 = vadd.f32 %v206_v3, %v2922_v55  ;;  %v208_v6 = vpop.f32.mrb[17].mxu0  ;;  %v2603_v0 = vld [vmem:[%s3399_s2 + $0x190] sm:$0xff]   ;;  %v2606_v2 = vld [vmem:[%s3399_s2 + $0x1d8] sm:$0xff]   ;;  %v2608_v3 = vld [vmem:[%s3399_s2 + $0x160] sm:$0xff]  }
 0x103   :  { %v209_v7 = vadd.f32 %v208_v6, %v2925_v60  ;;  %v210_v8 = vpop.f32.mrb[18].mxu0  ;;  %v2610_v6 = vld [vmem:[%s3399_s2 + $0x1e0] sm:$0xff]  }
 0x104   :  { %vm241_vm2 = vcmp.ge.f32.partialorder %v207_v5, 0.0  ;;  %v265_v9 = vmul.f32 0.01, %v207_v5  ;;  %v211_v10 = vadd.f32 %v210_v8, %v2922_v55  ;;  %v212_v11 = vpop.f32.mrb[19].mxu0  ;;  %v2611_v8 = vld [vmem:[%s3399_s2 + $0x1a0] sm:$0xff]  }
 0x105   :  { %vm242_vm3 = vcmp.ge.f32.partialorder %v209_v7, 0.0  ;;  %v266_v12 = vmul.f32 0.01, %v209_v7  ;;  %v213_v13 = vadd.f32 %v212_v11, %v2925_v60  ;;  %v2616_v11 = vld [vmem:[%s3399_s2 + $0x170] sm:$0xff]  }
 0x106   :  { %v289_v14 = vsel %vm241_vm2, %v207_v5, %v265_v9  ;;  %vm243_vm4 = vcmp.ge.f32.partialorder %v211_v10, 0.0  ;;  %v267_v15 = vmul.f32 0.01, %v211_v10  ;;  %v2609_v5 = vld [vmem:[%s3399_s2 + $0x120] sm:$0xff]   ;;  %v2613_v9 = vld [vmem:[%s3399_s2 + $0x128] sm:$0xff]  }
 0x107   :  { %v307_v16 = vmax.f32 %v301_v43, %v289_v14  ;;  %v290_v17 = vsel %vm242_vm3, %v209_v7, %v266_v12  ;;  %vm244_vm5 = vcmp.ge.f32.partialorder %v213_v13, 0.0  ;;  %v268_v18 = vmul.f32 0.01, %v213_v13  ;;  %v2612_v7 = vld [vmem:[%s3399_s2 + $0x168] sm:$0xff]   ;;  %v2618_v14 = vld [vmem:[%s3399_s2 + $0x1f0] sm:$0xff]  }
 0x108   :  { %v308_v19 = vmax.f32 %v302_v46, %v290_v17  ;;  %v291_v20 = vsel %vm243_vm4, %v211_v10, %v267_v15  ;;  %v2614_v10 = vld [vmem:[%s3399_s2 + $0x1e8] sm:$0xff]   ;;  %v2620_v15 = vld [vmem:[%s3399_s2 + $0x178] sm:$0xff]  }
 0x109   :  { %v2947_v21 = vmax.f32 %v303_v59, %v291_v20  ;;  %v292_v22 = vsel %vm244_vm5, %v213_v13, %v268_v18  ;;  %v216_v23 = vpop.f32.mrb[20].mxu0  ;;  %v2601_v59 = vld [vmem:[%s3399_s2 + $0x110] sm:$0xff]   ;;  %v2615_v12 = vld [vmem:[%s3399_s2 + $0x1a8] sm:$0xff]   ;;  %v2621_v17 = vld [vmem:[%s3399_s2 + $0x138] sm:$0xff]  }
 0x10a   :  { %v310_v24 = vmax.f32 %v304_v63, %v292_v22  ;;  %v217_v25 = vadd.f32 %v216_v23, %v2922_v55  ;;  %v218_v26 = vpop.f32.mrb[21].mxu0  ;;  %v2617_v13 = vld [vmem:[%s3399_s2 + $0x130] sm:$0xff]   ;;  %v2622_v18 = vld [vmem:[%s3399_s2 + $0x1f8] sm:$0xff]   ;;  %v2624_v20 = vld [vmem:[%s3399_s2 + $0x240] sm:$0xff]  }
 0x10b   :  { %v219_v27 = vadd.f32 %v218_v26, %v2925_v60  ;;  %v220_v28 = vpop.f32.mrb[22].mxu0  ;;  %v343_v29 = vpack.c.bf16 %v2947_v21, %v2947_v21  ;;  %v317_v30 = vrot.slane %v2947_v21, 2  ;;  %v2623_v22 = vld [vmem:[%s3399_s2 + $0x1b8] sm:$0xff]   ;;  %v2625_v23 = vld [vmem:[%s3399_s2 + $0x200] sm:$0xff]  }
 0x10c   :  { %vm245_vm6 = vcmp.ge.f32.partialorder %v217_v25, 0.0  ;;  %v269_v31 = vmul.f32 0.01, %v217_v25  ;;  %v221_v32 = vadd.f32 %v220_v28, %v2922_v55  ;;  %v222_v33 = vpop.f32.mrb[23].mxu0  ;;  %v344_v34 = vpack.c.bf16 %v310_v24, %v310_v24  ;;  %v2626_v26 = vld [vmem:[%s3399_s2 + $0x2c0] sm:$0xff]   ;;  %v2628_v28 = vld [vmem:[%s3399_s2 + $0x248] sm:$0xff]  }
 0x10d   :  { %vm246_vm7 = vcmp.ge.f32.partialorder %v219_v27, 0.0  ;;  %v270_v36 = vmul.f32 0.01, %v219_v27  ;;  %v223_v37 = vadd.f32 %v222_v33, %v2925_v60  ;;  %v318_v38 = vrot.slane %v310_v24, 2 }
 0x10e   :  { %v293_v40 = vsel %vm245_vm6, %v217_v25, %v269_v31  ;;  %vm247_vm8 = vcmp.ge.f32.partialorder %v221_v32, 0.0  ;;  %v271_v41 = vmul.f32 0.01, %v221_v32  ;;  %1546 = vmatprep.mubr.bf16.mxu1 %v344_v34  ;;  %v322_v55 = vrot.slane %v310_v24, 4  ;;  %v2629_v31 = vld [vmem:[%s3399_s2 + $0x208] sm:$0xff]   ;;  %v2632_v34 = vld [vmem:[%s3399_s2 + $0x250] sm:$0xff]  }
 0x10f   :  { %v2962_v42 = vmax.f32 %v305_v1, %v293_v40  ;;  %v294_v43 = vsel %vm246_vm7, %v219_v27, %v270_v36  ;;  %vm248_vm9 = vcmp.ge.f32.partialorder %v223_v37, 0.0  ;;  %v272_v44 = vmul.f32 0.01, %v223_v37  ;;  %1547 = vmatmul.mubr.bf16.vlgmr.msra.gmra.mrb[0].mxu1 %v343_v29  ;;  %v2605_v1 = vld [vmem:[%s3399_s2 + $0x118] sm:$0xff]   ;;  %v2633_v36 = vld [vmem:[%s3399_s2 + $0x210] sm:$0xff]  }
 0x110   :  { %v2964_v45 = vmax.f32 %v306_v4, %v294_v43  ;;  %v295_v46 = vsel %vm247_vm8, %v221_v32, %v271_v41  ;;  %2331 = vmatpush3.bf16.msra.mxu1 %v2593_v35  ;;  %v346_v60 = vpack.c.bf16 %v318_v38, %v318_v38  ;;  %v348_v47 = vpack.c.bf16 %v322_v55, %v322_v55  ;;  %v2607_v4 = vld [vmem:[%s3399_s2 + $0x198] sm:$0xff]   ;;  %v2630_v32 = vld [vmem:[%s3399_s2 + $0x2c8] sm:$0xff]   ;;  %v2640_v55 = vld [vmem:[%s3399_s2 + $0x260] sm:$0xff]  }
 0x111   :  { %v2972_v50 = vmax.f32 %v307_v16, %v295_v46  ;;  %v345_v51 = vpack.c.bf16 %v317_v30, %v317_v30  ;;  %2332 = vmatprep.subr.bf16.mxu1 %v2596_v39  ;;  %v326_v52 = vrot.slane %v310_v24, 6  ;;  %v296_v54 = vsel %vm248_vm9, %v223_v37, %v272_v44  ;;  %v2619_v16 = vld [vmem:[%s3399_s2 + $0x1b0] sm:$0xff]   ;;  %v2631_v35 = vld [vmem:[%s3399_s2 + $0x288] sm:$0xff]   ;;  %v2636_v38 = vld [vmem:[%s3399_s2 + $0x258] sm:$0xff]  }
 0x112   :  { %1586 = vmatprep.mubr.bf16.mxu0 %v346_v60  ;;  %1626 = vmatprep.mubr.bf16.mxu1 %v348_v47  ;;  %v2992_v63 = vmax.f32 %v308_v19, %v296_v54  ;;  %v321_v19 = vrot.slane %v2947_v21, 4  ;;  %v325_v25 = vrot.slane %v2947_v21, 6  ;;  %v332_v27 = vrot.slane %v2964_v45, 2  ;;  %v2627_v21 = vld [vmem:[%s3399_s2 + $0x280] sm:$0xff]   ;;  %v2634_v37 = vld [vmem:[%s3399_s2 + $0x2d0] sm:$0xff]   ;;  %v2637_v40 = vld [vmem:[%s3399_s2 + $0x218] sm:$0xff]  }
 0x113   :  { %1587 = vmatmul.mubr.bf16.vlgmr.msra.gmra.mrb[24].mxu0 %v345_v51  ;;  %v350_v57 = vpack.c.bf16 %v326_v52, %v326_v52  ;;  %v352_v29 = vpack.c.bf16 %v2964_v45, %v2964_v45  ;;  %v2635_v39 = vld [vmem:[%s3399_s2 + $0x290] sm:$0xff]   ;;  %v2638_v41 = vld [vmem:[%s3399_s2 + $0x2d8] sm:$0xff]   ;;  %v2641_v44 = vld [vmem:[%s3399_s2 + $0x220] sm:$0xff]  }
 0x114   :  { %2353 = vmatpush3.bf16.msra.mxu0 %v2595_v48  ;;  %2333 = vmatpush3.bf16.msra.mxu1 %v2597_v49  ;;  %v347_v24 = vpack.c.bf16 %v321_v19, %v321_v19  ;;  %v349_v30 = vpack.c.bf16 %v325_v25, %v325_v25  ;;  %v354_v33 = vpack.c.bf16 %v332_v27, %v332_v27  ;;  %v2639_v43 = vld [vmem:[%s3399_s2 + $0x298] sm:$0xff]   ;;  %v2642_v46 = vld [vmem:[%s3399_s2 + $0x2e0] sm:$0xff]   ;;  %v2644_v60 = vld [vmem:[%s3399_s2 + $0x268] sm:$0xff]  }
 0x115   :  { %1666 = vmatprep.mubr.bf16.mxu0 %v350_v57  ;;  %2354 = vmatprep.subr.bf16.mxu0 %v2598_v53  ;;  %v2643_v47 = vld [vmem:[%s3399_s2 + $0x2a0] sm:$0xff]   ;;  %v2645_v48 = vld [vmem:[%s3399_s2 + $0x228] sm:$0xff]   ;;  %v2648_v51 = vld [vmem:[%s3399_s2 + $0x270] sm:$0xff]  }
 0x116   :  { %2334 = vmatprep.subr.bf16.mxu1 %v2600_v56  ;;  %v2646_v49 = vld [vmem:[%s3399_s2 + $0x2e8] sm:$0xff]   ;;  %v2649_v53 = vld [vmem:[%s3399_s2 + $0x230] sm:$0xff]   ;;  %v2652_v56 = vld [vmem:[%s3399_s2 + $0x278] sm:$0xff]  }
 0x117   :  { %v2647_v52 = vld [vmem:[%s3399_s2 + $0x2a8] sm:$0xff]   ;;  %v2650_v54 = vld [vmem:[%s3399_s2 + $0x2f0] sm:$0xff]   ;;  %v2670_v19 = vld [vmem:[%s3399_s2 + $0x3d8] sm:$0xff]  }
 0x118   :  { %2355 = vmatpush3.bf16.msra.mxu0 %v2599_v58  ;;  %2335 = vmatpush3.bf16.msra.mxu1 %v2601_v59  ;;  %v2651_v57 = vld [vmem:[%s3399_s2 + $0x2b0] sm:$0xff]   ;;  %v2653_v58 = vld [vmem:[%s3399_s2 + $0x238] sm:$0xff]   ;;  %v2676_v25 = vld [vmem:[%s3399_s2 + $0x368] sm:$0xff]  }
 0x119   :  { %2356 = vmatprep.subr.bf16.mxu0 %v2602_v61  ;;  %2336 = vmatprep.subr.bf16.mxu1 %v2604_v62  ;;  %v2654_v59 = vld [vmem:[%s3399_s2 + $0x2f8] sm:$0xff]   ;;  %v2656_v61 = vld [vmem:[%s3399_s2 + $0x340] sm:$0xff]   ;;  %v336_v62 = vrot.slane %v2964_v45, 4  ;;  %v2677_v27 = vld [vmem:[%s3399_s2 + $0x328] sm:$0xff]  }
 0x11c   :  { %2357 = vmatpush3.bf16.msra.mxu0 %v2603_v0  ;;  %2337 = vmatpush3.bf16.msra.mxu1 %v2605_v1  ;;  %v2655_v0 = vld [vmem:[%s3399_s2 + $0x2b8] sm:$0xff]   ;;  %v2657_v1 = vld [vmem:[%s3399_s2 + $0x300] sm:$0xff]  }
 0x11d   :  { %2358 = vmatprep.subr.bf16.mxu0 %v2606_v2  ;;  %2338 = vmatprep.subr.bf16.mxu1 %v2608_v3  ;;  %v331_v2 = vrot.slane %v2962_v42, 2  ;;  %v351_v3 = vpack.c.bf16 %v2962_v42, %v2962_v42 }
 0x120   :  { %2359 = vmatpush3.bf16.msra.mxu0 %v2607_v4  ;;  %2339 = vmatpush3.bf16.msra.mxu1 %v2609_v5  ;;  %v2658_v4 = vld [vmem:[%s3399_s2 + $0x3c0] sm:$0xff]   ;;  %v340_v5 = vrot.slane %v2964_v45, 6  ;;  %v2662_v45 = vld [vmem:[%s3399_s2 + $0x3c8] sm:$0xff]  }
 0x121   :  { %2360 = vmatprep.subr.bf16.mxu0 %v2610_v6  ;;  %2340 = vmatprep.subr.bf16.mxu1 %v2612_v7  ;;  %v2660_v6 = vld [vmem:[%s3399_s2 + $0x348] sm:$0xff]   ;;  %v356_v7 = vpack.c.bf16 %v336_v62, %v336_v62 }
 0x122   :  { %v2705_v62 = vld [vmem:[%s3400_s3 + $0x8] sm:$0xff]  }
 0x124   :  { %2361 = vmatpush3.bf16.msra.mxu0 %v2611_v8  ;;  %2341 = vmatpush3.bf16.msra.mxu1 %v2613_v9  ;;  %v2659_v8 = vld [vmem:[%s3399_s2 + $0x380] sm:$0xff]   ;;  %v353_v9 = vpack.c.bf16 %v331_v2, %v331_v2 }
 0x125   :  { %2362 = vmatprep.subr.bf16.mxu0 %v2614_v10  ;;  %2342 = vmatprep.subr.bf16.mxu1 %v2616_v11  ;;  %v2661_v10 = vld [vmem:[%s3399_s2 + $0x308] sm:$0xff]   ;;  %v358_v11 = vpack.c.bf16 %v340_v5, %v340_v5 }
 0x126   :  { %v2709_v5 = vld [vmem:[%s3400_s3 + $0x28] sm:$0xff]  }
 0x128   :  { %2363 = vmatpush3.bf16.msra.mxu0 %v2615_v12  ;;  %2343 = vmatpush3.bf16.msra.mxu1 %v2617_v13  ;;  %v2664_v12 = vld [vmem:[%s3399_s2 + $0x350] sm:$0xff]   ;;  %v2663_v13 = vld [vmem:[%s3399_s2 + $0x388] sm:$0xff]  }
 0x129   :  { %2364 = vmatprep.subr.bf16.mxu0 %v2618_v14  ;;  %2344 = vmatprep.subr.bf16.mxu1 %v2620_v15  ;;  %v2665_v14 = vld [vmem:[%s3399_s2 + $0x310] sm:$0xff]  }
 0x12a   :  { %v2666_v15 = vld [vmem:[%s3399_s2 + $0x3d0] sm:$0xff]  }
 0x12c   :  { %2365 = vmatpush3.bf16.msra.mxu0 %v2619_v16  ;;  %2345 = vmatpush3.bf16.msra.mxu1 %v2621_v17  ;;  %v2668_v16 = vld [vmem:[%s3399_s2 + $0x358] sm:$0xff]   ;;  %v2667_v17 = vld [vmem:[%s3399_s2 + $0x390] sm:$0xff]  }
 0x12d   :  { %2366 = vmatprep.subr.bf16.mxu0 %v2622_v18  ;;  %2374 = vmatprep.subr.bf16.mxu1 %v2624_v20  ;;  %v2669_v18 = vld [vmem:[%s3399_s2 + $0x318] sm:$0xff]   ;;  %v2672_v20 = vld [vmem:[%s3399_s2 + $0x360] sm:$0xff]  }
 0x12f   :  { %1627 = vmatmul.mubr.bf16.vlgmr.msra.gmra.mrb[4].mxu1 %v347_v24  ;;  %v2674_v24 = vld [vmem:[%s3399_s2 + $0x3e0] sm:$0xff]  }
 0x130   :  { %2367 = vmatpush3.bf16.msra.mxu0 %v2623_v22  ;;  %2375 = vmatpush3.bf16.msra.mxu1 %v2625_v23  ;;  %v2671_v22 = vld [vmem:[%s3399_s2 + $0x398] sm:$0xff]   ;;  %v2673_v23 = vld [vmem:[%s3399_s2 + $0x320] sm:$0xff]  }
 0x131   :  { %1706 = vmatprep.mubr.bf16.mxu1 %v352_v29  ;;  %2396 = vmatprep.subr.bf16.mxu0 %v2626_v26  ;;  %v2675_v26 = vld [vmem:[%s3399_s2 + $0x3a0] sm:$0xff]   ;;  %v2680_v29 = vld [vmem:[%s3399_s2 + $0x370] sm:$0xff]  }
 0x132   :  { %2376 = vmatprep.subr.bf16.mxu1 %v2628_v28  ;;  %v2678_v28 = vld [vmem:[%s3399_s2 + $0x3e8] sm:$0xff]  }
 0x133   :  { %1667 = vmatmul.mubr.bf16.vlgmr.msra.gmra.mrb[28].mxu0 %v349_v30  ;;  %v2681_v30 = vld [vmem:[%s3399_s2 + $0x330] sm:$0xff]  }
 0x134   :  { %2397 = vmatpush3.bf16.msra.mxu0 %v2627_v21  ;;  %1746 = vmatprep.mubr.bf16.mxu0 %v354_v33  ;;  %v2679_v21 = vld [vmem:[%s3399_s2 + $0x3a8] sm:$0xff]   ;;  %v2683_v33 = vld [vmem:[%s3399_s2 + $0x3b0] sm:$0xff]  }
 0x135   :  { %2377 = vmatpush3.bf16.msra.mxu1 %v2629_v31  ;;  %2398 = vmatprep.subr.bf16.mxu0 %v2630_v32  ;;  %v2682_v31 = vld [vmem:[%s3399_s2 + $0x3f0] sm:$0xff]   ;;  %v2684_v32 = vld [vmem:[%s3399_s2 + $0x378] sm:$0xff]  }
 0x136   :  { %2378 = vmatprep.subr.bf16.mxu1 %v2632_v34  ;;  %v2685_v34 = vld [vmem:[%s3399_s2 + $0x338] sm:$0xff]  }
 0x138   :  { %2399 = vmatpush3.bf16.msra.mxu0 %v2631_v35  ;;  %v2686_v35 = vld [vmem:[%s3399_s2 + $0x3f8] sm:$0xff]  }
 0x139   :  { %2379 = vmatpush3.bf16.msra.mxu1 %v2633_v36  ;;  %2400 = vmatprep.subr.bf16.mxu0 %v2634_v37  ;;  %v335_v36 = vrot.slane %v2962_v42, 4  ;;  %v2688_v37 = vld [vmem:[%s3399_s2 + $0x440] sm:$0xff]  }
 0x13a   :  { %2380 = vmatprep.subr.bf16.mxu1 %v2636_v38  ;;  %v2687_v38 = vld [vmem:[%s3399_s2 + $0x3b8] sm:$0xff]  }
 0x13c   :  { %2401 = vmatpush3.bf16.msra.mxu0 %v2635_v39  ;;  %v2689_v39 = vld [vmem:[%s3399_s2 + $0x400] sm:$0xff]  }
 0x13d   :  { %2381 = vmatpush3.bf16.msra.mxu1 %v2637_v40  ;;  %2402 = vmatprep.subr.bf16.mxu0 %v2638_v41  ;;  %v339_v40 = vrot.slane %v2962_v42, 6  ;;  %v355_v41 = vpack.c.bf16 %v335_v36, %v335_v36  ;;  %v2692_v42 = vld [vmem:[%s3399_s2 + $0x450] sm:$0xff]  }
 0x13e   :  { %2382 = vmatprep.subr.bf16.mxu1 %v2640_v55  ;;  %v2690_v55 = vld [vmem:[%s3399_s2 + $0x448] sm:$0xff]  }
 0x140   :  { %2403 = vmatpush3.bf16.msra.mxu0 %v2639_v43  ;;  %v360_v43 = vpack.c.bf16 %v2992_v63, %v2992_v63  ;;  %v2693_v63 = vld [vmem:[%s3399_s2 + $0x410] sm:$0xff]  }
 0x141   :  { %2383 = vmatpush3.bf16.msra.mxu1 %v2641_v44  ;;  %2404 = vmatprep.subr.bf16.mxu0 %v2642_v46  ;;  %v357_v44 = vpack.c.bf16 %v339_v40, %v339_v40  ;;  %v2691_v46 = vld [vmem:[%s3399_s2 + $0x408] sm:$0xff]  }
 0x142   :  { %2384 = vmatprep.subr.bf16.mxu1 %v2644_v60  ;;  %v2694_v60 = vld [vmem:[%s3399_s2 + $0x458] sm:$0xff]  }
 0x144   :  { %2405 = vmatpush3.bf16.msra.mxu0 %v2643_v47  ;;  %v2695_v47 = vld [vmem:[%s3399_s2 + $0x418] sm:$0xff]  }
 0x145   :  { %2385 = vmatpush3.bf16.msra.mxu1 %v2645_v48  ;;  %2406 = vmatprep.subr.bf16.mxu0 %v2646_v49  ;;  %v2696_v48 = vld [vmem:[%s3399_s2 + $0x460] sm:$0xff]  }
 0x146   :  { %2386 = vmatprep.subr.bf16.mxu1 %v2648_v51  ;;  %v2697_v49 = vld [vmem:[%s3399_s2 + $0x420] sm:$0xff]   ;;  %v2698_v51 = vld [vmem:[%s3399_s2 + $0x468] sm:$0xff]  }
 0x148   :  { %2407 = vmatpush3.bf16.msra.mxu0 %v2647_v52  ;;  %v2699_v52 = vld [vmem:[%s3399_s2 + $0x428] sm:$0xff]  }
 0x149   :  { %2387 = vmatpush3.bf16.msra.mxu1 %v2649_v53  ;;  %2408 = vmatprep.subr.bf16.mxu0 %v2650_v54  ;;  %v2700_v53 = vld [vmem:[%s3399_s2 + $0x470] sm:$0xff]  }
 0x14a   :  { %2388 = vmatprep.subr.bf16.mxu1 %v2652_v56  ;;  %v2701_v54 = vld [vmem:[%s3399_s2 + $0x430] sm:$0xff]   ;;  %v2702_v56 = vld [vmem:[%s3399_s2 + $0x478] sm:$0xff]  }
 0x14c   :  { %2409 = vmatpush3.bf16.msra.mxu0 %v2651_v57  ;;  %v2703_v57 = vld [vmem:[%s3399_s2 + $0x438] sm:$0xff]  }
 0x14d   :  { %2389 = vmatpush3.bf16.msra.mxu1 %v2653_v58  ;;  %2410 = vmatprep.subr.bf16.mxu0 %v2654_v59  ;;  %v359_v58 = vpack.c.bf16 %v2972_v50, %v2972_v50  ;;  %v2704_v59 = vld [vmem:[%s3400_s3] sm:$0xff]   ;;  %v2706_v50 = vld [vmem:[%s3400_s3 + $0x10] sm:$0xff]  }
 0x14e   :  { %2418 = vmatprep.subr.bf16.mxu1 %v2656_v61  ;;  %v2745_v61 = vmov 0.0  }
 0x150   :  { %2411 = vmatpush3.bf16.msra.mxu0 %v2655_v0  ;;  %1707 = vmatmul.mubr.bf16.vlgmr.msra.gmra.mrb[8].mxu1 %v351_v3  ;;  %v2707_v0 = vld [vmem:[%s3400_s3 + $0x18] sm:$0xff]   ;;  %v649_v3 = vld [vmem:[%s3401_s4 + $0x1] ss:$0 sm:$0xff] }
 0x151   :  { %2419 = vmatpush3.bf16.msra.mxu1 %v2657_v1  ;;  %1786 = vmatprep.mubr.bf16.mxu1 %v356_v7  ;;  %v2708_v1 = vld [vmem:[%s3400_s3 + $0x20] sm:$0xff]  }
 0x152   :  { %2440 = vmatprep.subr.bf16.mxu0 %v2658_v4  ;;  %2420 = vmatprep.subr.bf16.mxu1 %v2660_v6 }
 0x153   :  { %1747 = vmatmul.mubr.bf16.vlgmr.msra.gmra.mrb[32].mxu0 %v353_v9 }
 0x154   :  { %2441 = vmatpush3.bf16.msra.mxu0 %v2659_v8  ;;  %1826 = vmatprep.mubr.bf16.mxu0 %v358_v11 }
 0x155   :  { %2421 = vmatpush3.bf16.msra.mxu1 %v2661_v10  ;;  %2442 = vmatprep.subr.bf16.mxu0 %v2662_v45 }
 0x156   :  { %2422 = vmatprep.subr.bf16.mxu1 %v2664_v12 }
 0x158   :  { %2443 = vmatpush3.bf16.msra.mxu0 %v2663_v13 }
 0x159   :  { %2423 = vmatpush3.bf16.msra.mxu1 %v2665_v14  ;;  %2444 = vmatprep.subr.bf16.mxu0 %v2666_v15  ;;  %v2710_v15 = vld [vmem:[%s3400_s3 + $0x30] sm:$0xff]  }
 0x15a   :  { %2424 = vmatprep.subr.bf16.mxu1 %v2668_v16  ;;  %v2711_v16 = vld [vmem:[%s3400_s3 + $0x38] sm:$0xff]  }
 0x15c   :  { %2445 = vmatpush3.bf16.msra.mxu0 %v2667_v17  ;;  %v2712_v17 = vld [vmem:[%s3400_s3 + $0x40] sm:$0xff]  }
 0x15d   :  { %2425 = vmatpush3.bf16.msra.mxu1 %v2669_v18  ;;  %2446 = vmatprep.subr.bf16.mxu0 %v2670_v19  ;;  %v2713_v18 = vld [vmem:[%s3400_s3 + $0x48] sm:$0xff]   ;;  %v2714_v19 = vld [vmem:[%s3400_s3 + $0x50] sm:$0xff]  }
 0x15e   :  { %2426 = vmatprep.subr.bf16.mxu1 %v2672_v20  ;;  %v2715_v20 = vld [vmem:[%s3400_s3 + $0x58] sm:$0xff]  }
 0x160   :  { %2447 = vmatpush3.bf16.msra.mxu0 %v2671_v22  ;;  %v2716_v22 = vld [vmem:[%s3400_s3 + $0x60] sm:$0xff]  }
 0x161   :  { %2427 = vmatpush3.bf16.msra.mxu1 %v2673_v23  ;;  %2448 = vmatprep.subr.bf16.mxu0 %v2674_v24  ;;  %v2717_v23 = vld [vmem:[%s3400_s3 + $0x68] sm:$0xff]  }
 0x162   :  { %2428 = vmatprep.subr.bf16.mxu1 %v2676_v25 }
 0x164   :  { %2449 = vmatpush3.bf16.msra.mxu0 %v2675_v26 }
 0x165   :  { %2429 = vmatpush3.bf16.msra.mxu1 %v2677_v27  ;;  %2450 = vmatprep.subr.bf16.mxu0 %v2678_v28 }
 0x166   :  { %2430 = vmatprep.subr.bf16.mxu1 %v2680_v29 }
 0x168   :  { %2451 = vmatpush3.bf16.msra.mxu0 %v2679_v21 }
 0x169   :  { %2431 = vmatpush3.bf16.msra.mxu1 %v2681_v30  ;;  %2452 = vmatprep.subr.bf16.mxu0 %v2682_v31 }
 0x16a   :  { %2432 = vmatprep.subr.bf16.mxu1 %v2684_v32 }
 0x16c   :  { %2453 = vmatpush3.bf16.msra.mxu0 %v2683_v33 }
 0x16d   :  { %2433 = vmatpush3.bf16.msra.mxu1 %v2685_v34  ;;  %2454 = vmatprep.subr.bf16.mxu0 %v2686_v35 }
 0x16e   :  { %2462 = vmatprep.subr.bf16.mxu1 %v2688_v37 }
 0x170   :  { %2455 = vmatpush3.bf16.msra.mxu0 %v2687_v38  ;;  %1787 = vmatmul.mubr.bf16.vlgmr.msra.gmra.mrb[12].mxu1 %v355_v41 }
 0x171   :  { %2463 = vmatpush3.bf16.msra.mxu1 %v2689_v39  ;;  %1866 = vmatprep.mubr.bf16.mxu1 %v360_v43 }
 0x172   :  { %2464 = vmatprep.subr.bf16.mxu1 %v2690_v55  ;;  %2502 = vmatprep.subr.bf16.mxu0 %v2745_v61 }
 0x173   :  { %1827 = vmatmul.mubr.bf16.vlgmr.msra.gmra.mrb[36].mxu0 %v357_v44 }
 0x174   :  { %2503 = vmatpush3.bf16.msra.mxu0 %v2704_v59  ;;  %2518 = vmatprep.mubr.msk.bf16.mxu0 %vm2746_vm10, %v2745_v61 }
 0x175   :  { %2465 = vmatpush3.bf16.msra.mxu1 %v2691_v46  ;;  %2504 = vmatprep.subr.bf16.mxu0 %v2745_v61 }
 0x176   :  { %2466 = vmatprep.subr.bf16.mxu1 %v2692_v42 }
 0x178   :  { %2505 = vmatpush3.bf16.msra.mxu0 %v2705_v62 }
 0x179   :  { %2467 = vmatpush3.bf16.msra.mxu1 %v2693_v63  ;;  %2506 = vmatprep.subr.bf16.mxu0 %v2745_v61 }
 0x17a   :  { %2468 = vmatprep.subr.bf16.mxu1 %v2694_v60 }
 0x17c   :  { %2507 = vmatpush3.bf16.msra.mxu0 %v2706_v50 }
 0x17d   :  { %2469 = vmatpush3.bf16.msra.mxu1 %v2695_v47  ;;  %2508 = vmatprep.subr.bf16.mxu0 %v2745_v61 }
 0x17e   :  { %2470 = vmatprep.subr.bf16.mxu1 %v2696_v48 }
 0x180   :  { %2509 = vmatpush3.bf16.msra.mxu0 %v2707_v0 }
 0x181   :  { %2471 = vmatpush3.bf16.msra.mxu1 %v2697_v49  ;;  %2510 = vmatprep.subr.bf16.mxu0 %v2745_v61 }
 0x182   :  { %2472 = vmatprep.subr.bf16.mxu1 %v2698_v51 }
 0x184   :  { %2511 = vmatpush3.bf16.msra.mxu0 %v2708_v1 }
 0x185   :  { %2473 = vmatpush3.bf16.msra.mxu1 %v2699_v52  ;;  %2512 = vmatprep.subr.bf16.mxu0 %v2745_v61 }
 0x186   :  { %2474 = vmatprep.subr.bf16.mxu1 %v2700_v53 }
 0x188   :  { %2513 = vmatpush3.bf16.msra.mxu0 %v2709_v5 }
 0x189   :  { %2475 = vmatpush3.bf16.msra.mxu1 %v2701_v54  ;;  %2514 = vmatprep.subr.bf16.mxu0 %v2745_v61 }
 0x18a   :  { %2476 = vmatprep.subr.bf16.mxu1 %v2702_v56 }
 0x18c   :  { %2515 = vmatpush3.bf16.msra.mxu0 %v2710_v15 }
 0x18d   :  { %2477 = vmatpush3.bf16.msra.mxu1 %v2703_v57  ;;  %2516 = vmatprep.subr.bf16.mxu0 %v2745_v61 }
 0x18e   :  { %2522 = vmatprep.subr.bf16.mxu1 %v2745_v61 }
 0x190   :  { %1867 = vmatmul.mubr.bf16.vlgmr.msra.gmra.mrb[16].mxu1 %v359_v58  ;;  %2517 = vmatpush3.bf16.msra.mxu0 %v2711_v16  ;;  %v2003_v16 = vld [vmem:[%s3401_s4 + $0x3] ss:$0 sm:$0xff] }
 0x191   :  { %2538 = vmatprep.mubr.msk.bf16.mxu1 %vm2746_vm10, %v2745_v61  ;;  %2523 = vmatpush3.bf16.msra.mxu1 %v2712_v17 }
 0x192   :  { %2524 = vmatprep.subr.bf16.mxu1 %v2745_v61 }
 0x195   :  { %2525 = vmatpush3.bf16.msra.mxu1 %v2713_v18 }
 0x196   :  { %2526 = vmatprep.subr.bf16.mxu1 %v2745_v61 }
 0x199   :  { %2527 = vmatpush3.bf16.msra.mxu1 %v2714_v19 }
 0x19a   :  { %2528 = vmatprep.subr.bf16.mxu1 %v2745_v61 }
 0x19d   :  { %2529 = vmatpush3.bf16.msra.mxu1 %v2715_v20 }
 0x19e   :  { %2530 = vmatprep.subr.bf16.mxu1 %v2745_v61 }
 0x1a1   :  { %2531 = vmatpush3.bf16.msra.mxu1 %v2716_v22 }
 0x1a2   :  { %2532 = vmatprep.subr.bf16.mxu1 %v2745_v61 }
 0x1a5   :  { %2533 = vmatpush3.bf16.msra.mxu1 %v2717_v23 }
 0x1a6   :  { %2534 = vmatprep.subr.bf16.mxu1 %v2745_v61 }
 0x1e2   :  { %v2302_v2 = vpop.f32.mrb[0].mxu1 }
 0x1e3   :  { %v2303_v4 = vpop.f32.mrb[1].mxu1 }
 0x1e4   :  { %v2304_v6 = vadd.f32 %v2303_v4, %v2302_v2  ;;  %v2305_v7 = vpop.f32.mrb[2].mxu1 }
 0x1e5   :  { %v2306_v8 = vpop.f32.mrb[3].mxu1  ;;  %v2719_v7 = vld [vmem:[%s3400_s3 + $0x78] sm:$0xff]  }
 0x1e6   :  { %v1549_v9 = vadd.f32 %v2304_v6, %v649_v3  ;;  %v2324_v10 = vpop.f32.mrb[24].mxu0  ;;  %v2718_v6 = vld [vmem:[%s3400_s3 + $0x70] sm:$0xff]   ;;  %v1894_v8 = vld [vmem:[%s3401_s4 + $0x2] ss:$0 sm:$0xff]  ;;  %s2747_s3 = smov [#allocation2]  }
 0x1e7   :  { %v2325_v45 = vpop.f32.mrb[25].mxu0  ;;  %2535 = vmatpush3.bf16.msra.mxu1 %v2718_v6  ;;  %s2099_s16 = sshll.u32 %s2747_s3, 4  ;;  %s2100_s16 = int_to_ptr.vmem [resolvable:$true] %s2099_s16 }
 0x1e8   :  { %v2326_v11 = vadd.f32 %v2325_v45, %v2324_v10  ;;  %v2327_v12 = vpop.f32.mrb[26].mxu0  ;;  %2536 = vmatprep.subr.bf16.mxu1 %v2745_v61  ;;  %s2720_s17 = scalar_lea.vmem %s2100_s16, 32  ;;  %p2725_p1 = scmp.lt.s32.totalorder %s2100_s16, %s2100_s16 }
 0x1e9   :  { %v2328_v13 = vpop.f32.mrb[27].mxu0  ;;  %p2721_p0 = scmp.ne.s32.totalorder %s2100_s16, %s2720_s17  ;;  %p2726_p2 = scmp.lt.s32.totalorder %s2720_s17, %s2720_s17 }
 0x1ea   :  { %v1589_v14 = vadd.f32 %v2326_v11, %v1549_v9 }
 0x1eb   :  { %2537 = vmatpush3.bf16.msra.mxu1 %v2719_v7  ;;  %p2727_p3 = por %p2726_p2, %p2725_p1 }
 0x1ed   :  { %p2728_p4 = pnand %p2727_p3, %p2721_p0 }
 0x202   :  { %v2346_v24 = vpop.f32.mrb[4].mxu1 }
 0x203   :  { %v2347_v25 = vpop.f32.mrb[5].mxu1 }
 0x204   :  { %v2348_v26 = vadd.f32 %v2347_v25, %v2346_v24  ;;  %v2349_v27 = vpop.f32.mrb[6].mxu1 }
 0x205   :  { %v2350_v28 = vpop.f32.mrb[7].mxu1 }
 0x206   :  { %v1629_v29 = vadd.f32 %v2348_v26, %v1589_v14  ;;  %v2368_v21 = vpop.f32.mrb[28].mxu0 }
 0x207   :  { %v2369_v30 = vpop.f32.mrb[29].mxu0 }
 0x208   :  { %v2370_v31 = vadd.f32 %v2369_v30, %v2368_v21  ;;  %v2371_v32 = vpop.f32.mrb[30].mxu0 }
 0x209   :  { %v2372_v33 = vpop.f32.mrb[31].mxu0 }
 0x20a   :  { %v1669_v34 = vadd.f32 %v2370_v31, %v1629_v29 }
 0x223   :  { %v2390_v35 = vpop.f32.mrb[8].mxu1 }
 0x224   :  { %v2391_v36 = vpop.f32.mrb[9].mxu1 }
 0x225   :  { %v2392_v37 = vadd.f32 %v2391_v36, %v2390_v35  ;;  %v2393_v38 = vpop.f32.mrb[10].mxu1 }
 0x226   :  { %v2412_v39 = vpop.f32.mrb[32].mxu0  ;;  %v2394_v40 = vpop.f32.mrb[11].mxu1 }
 0x227   :  { %v1709_v41 = vadd.f32 %v2392_v37, %v1669_v34  ;;  %v2413_v55 = vpop.f32.mrb[33].mxu0 }
 0x228   :  { %v2414_v43 = vadd.f32 %v2413_v55, %v2412_v39  ;;  %v2415_v44 = vpop.f32.mrb[34].mxu0 }
 0x229   :  { %v2416_v46 = vpop.f32.mrb[35].mxu0 }
 0x22a   :  { %v1749_v42 = vadd.f32 %v2414_v43, %v1709_v41 }
 0x243   :  { %v2434_v63 = vpop.f32.mrb[12].mxu1 }
 0x244   :  { %v2435_v60 = vpop.f32.mrb[13].mxu1 }
 0x245   :  { %v2436_v47 = vadd.f32 %v2435_v60, %v2434_v63  ;;  %v2437_v48 = vpop.f32.mrb[14].mxu1 }
 0x246   :  { %v2456_v49 = vpop.f32.mrb[36].mxu0  ;;  %v2438_v51 = vpop.f32.mrb[15].mxu1 }
 0x247   :  { %v1789_v52 = vadd.f32 %v2436_v47, %v1749_v42  ;;  %v2457_v53 = vpop.f32.mrb[37].mxu0 }
 0x248   :  { %v2458_v54 = vadd.f32 %v2457_v53, %v2456_v49  ;;  %v2459_v56 = vpop.f32.mrb[38].mxu0 }
 0x249   :  { %v2460_v57 = vpop.f32.mrb[39].mxu0 }
 0x24a   :  { %v1829_v58 = vadd.f32 %v2458_v54, %v1789_v52 }
 0x263   :  { %v2478_v59 = vpop.f32.mrb[16].mxu1 }
 0x264   :  { %v2479_v62 = vpop.f32.mrb[17].mxu1 }
 0x265   :  { %v2480_v50 = vadd.f32 %v2479_v62, %v2478_v59  ;;  %v2481_v0 = vpop.f32.mrb[18].mxu1 }
 0x266   :  { %v2482_v1 = vpop.f32.mrb[19].mxu1 }
 0x267   :  { %v1869_v2 = vadd.f32 %v2480_v50, %v1829_v58 }
 0x269   :  { %vm1874_vm11 = vcmp.ge.f32.partialorder %v1869_v2, 0.0  ;;  %v1875_v3 = vmul.f32 0.01, %v1869_v2 }
 0x26b   :  { %v1876_v4 = vsel %vm1874_vm11, %v1869_v2, %v1875_v3 }
 0x26c   :  { %v1877_v5 = vpack.c.bf16 %v1876_v4, %v1876_v4 }
 0x26e   :  { %2519 = vmatmul.mubr.bf16.vlgmr.msra.gmra.mrb[40].mxu0 %v1877_v5 }
 0x341   :  { %v1977_v9 = vpop.f32.mrb[40].mxu0 }
 0x342   :  { %v1978_v10 = vadd.f32 %v1977_v9, %v1894_v8  ;;  %v2520_v45 = vpop.f32.mrb[41].mxu0 }
 0x343   :  { %v1980_v11 = vpop.f32.mrb[42].mxu0 }
 0x344   :  { %vm1983_vm12 = vcmp.ge.f32.partialorder %v1978_v10, 0.0  ;;  %v1984_v12 = vmul.f32 0.01, %v1978_v10  ;;  %v2521_v13 = vpop.f32.mrb[43].mxu0 }
 0x346   :  { %v1985_v14 = vsel %vm1983_vm12, %v1978_v10, %v1984_v12 }
 0x347   :  { %v1986_v15 = vpack.c.bf16 %v1985_v14, %v1985_v14 }
 0x349   :  { %2539 = vmatmul.mubr.bf16.vlgmr.msra.gmra.mrb[20].mxu1 %v1986_v15 }
 0x41c   :  { %v2086_v61 = vpop.f32.mrb[20].mxu1 }
 0x41d   :  { %v2087_v17 = vadd.f32 %v2086_v61, %v2003_v16  ;;  %v2540_v18 = vpop.f32.mrb[21].mxu1 }
 0x41e   :  { %v2089_v19 = vpop.f32.mrb[22].mxu1 }
 0x41f   :  { %2092 = vst [vmem:[#allocation2] sm:$0x3] %v2087_v17  ;;  %v2541_v20 = vpop.f32.mrb[23].mxu1 }
 0x420   :  { %2731 = shalt.err (!%p2728_p4)
}
 0x421   :  { %s2732_s4 = scalar_lea.hbm %s3402_s5, 32 }
 0x422   :  { %p2733_p5 = scmp.ne.s32.totalorder %s3402_s5, %s2732_s4  ;;  %p2736_p6 = scmp.lt.u32.totalorder %s2732_s4, %s3402_s5 }
 0x424   :  { %p2738_p7 = pnand %p2736_p6, %p2733_p5 }
 0x426   :  { %2741 = shalt.err (!%p2738_p7)
}
 0x427   :  { %2102 = dma.vmem_to_hbm [thread:$0]  %s2100_s16, 32, %s3402_s5, [#allocation3]  }
 0x428   :  { %2742 = dma.done.wait [#allocation3], 32  }
 0x429   :  { %2743 = vsyncadd [#allocation3], 4294967264 }
 0x42a   :  { %2106 = vsyncpa [#allocation3], 1 }

</bundles_post_ra>
